<compile_context>
chip_gen: v7x
topology: tpu7x:2x2x1
jax: 0.10.0
libtpu: 0.0.40
codegen_flags: <defaults>
</compile_context>

<pallas_src>
import functools
import math

import jax
import jax.numpy as jnp
from jax.experimental import pallas as pl
from jax.experimental.pallas import tpu as pltpu


# ---------------------------------------------------------------------------
# Small layout helpers (layout-preserving row <-> block reshapes)
# ---------------------------------------------------------------------------

def _to_rows(x):
    """(Bt, M, D) -> (Bt*M, D).  No-op relayout: M % 8 == 0 when Bt > 1."""
    bt, m, d = x.shape
    return x[0] if bt == 1 else x.reshape(bt * m, d)


def _to_blocks(x, bt, m):
    """(Bt*M, D) -> (Bt, M, D).  No-op relayout: M % 8 == 0 when Bt > 1."""
    return x[None] if bt == 1 else x.reshape(bt, m, x.shape[-1])


# ---------------------------------------------------------------------------
# Fused kernel: projections + per-head attention + output projection
# ---------------------------------------------------------------------------

def _fused_mha_kernel(*refs, n_heads, head_dim, bt, mq, mkv, has_out_proj,
                      compute_dtype):
    if has_out_proj:
        (xq_ref, xkv_ref, qw_ref, qb_ref, kw_ref, kb_ref,
         vw_ref, vb_ref, ow_ref, ob_ref, o_ref, ctx_ref) = refs
    else:
        (xq_ref, xkv_ref, qw_ref, qb_ref, kw_ref, kb_ref,
         vw_ref, vb_ref, o_ref, ctx_ref) = refs

    cdt = compute_dtype
    f32 = jnp.float32

    # Row-batched projections: (Bt*Mq, Dq) @ (Dq, D), etc.  Weights arrive
    # already in the MXU compute dtype (cast wrapper-side, once) and stay
    # resident in VMEM across the whole grid; the 1/sqrt(head_dim) scale is
    # pre-folded into q_w / q_b, so there is no per-step scaling or weight cast.
    xq = _to_rows(xq_ref[...]).astype(cdt)      # (Rt, Dq)
    xkv = _to_rows(xkv_ref[...]).astype(cdt)    # (Rkv, D)

    q = jnp.dot(xq, qw_ref[...], preferred_element_type=f32) + qb_ref[...]
    k = jnp.dot(xkv, kw_ref[...], preferred_element_type=f32) + kb_ref[...]
    v = jnp.dot(xkv, vw_ref[...], preferred_element_type=f32) + vb_ref[...]

    # Hoisted casts (once, not per head / per matmul), then view rows as
    # (Bt, M, D) so each head's attention is a single Bt-batched einsum.
    q = _to_blocks(q.astype(cdt), bt, mq)       # (Bt, Mq,  D)
    k = _to_blocks(k.astype(cdt), bt, mkv)      # (Bt, Mkv, D)
    v = _to_blocks(v.astype(cdt), bt, mkv)      # (Bt, Mkv, D)

    # Per-head attention.  Heads are few and static for tabular transformers;
    # each head's context goes straight into the f32 VMEM scratch (bounds the
    # vreg live ranges of the unrolled loop), and the out-projection below is
    # a single full-D matmul on the reassembled context.
    # TODO(synk): a 4-D head-batched dot_general would also remove the small
    # per-head lane slices below, but the (rows, D) -> (rows, H, head_dim)
    # lane-split reshape it requires is not reliably lowered by Mosaic.
    for h in range(n_heads):
        sl = slice(h * head_dim, (h + 1) * head_dim)
        s = jnp.einsum("bqd,bkd->bqk", q[..., sl], k[..., sl],
                       preferred_element_type=f32)         # (Bt, Mq, Mkv) f32
        m = jnp.max(s, axis=-1, keepdims=True)              # stable softmax
        p = jnp.exp(s - m)
        denom = jnp.sum(p, axis=-1, keepdims=True)
        inv = pl.reciprocal(denom, approx=True)              # EUP slot
        inv = inv * (2.0 - denom * inv)                      # one Newton step
        attn = (p * inv).astype(cdt)
        # TODO(synk): training-mode dropout on `attn` not implemented (eval).
        ctx_ref[:, :, sl] = jnp.einsum("bqk,bkd->bqd", attn, v[..., sl],
                                       preferred_element_type=f32)

    ctx = _to_rows(ctx_ref[...])                              # (Rt, D) f32
    if has_out_proj:
        out = jnp.dot(ctx.astype(cdt), ow_ref[...],
                      preferred_element_type=f32) + ob_ref[...]
    else:
        out = ctx                                             # n_heads == 1
    o_ref[...] = _to_blocks(out, bt, mq).astype(o_ref.dtype)


# ---------------------------------------------------------------------------
# Batch-block size selection
# ---------------------------------------------------------------------------

def _pick_block_batch(B, Mq, Mkv, target_rows=256, max_rows=2048):
    """Largest divisor Bt of B such that Bt*Mq reaches ~target rows (amortizes
    grid overhead and widens DMAs) while keeping row merges layout-preserving
    (M % 8 == 0 when Bt > 1) and the per-step block bounded."""
    best = 1
    for bt in range(1, B + 1):
        if B % bt:
            continue
        if bt > 1 and (Mq % 8 or Mkv % 8):
            break
        if bt * max(Mq, Mkv) > max_rows:
            break
        best = bt
        if bt * Mq >= target_rows:
            break
    # v7x has 2 TensorCores: prefer an even grid length when it doesn't cost
    # us the row-batching target.
    if (B // best) % 2 and best % 2 == 0 and (best // 2) * Mq >= target_rows:
        best //= 2
    return best


# ---------------------------------------------------------------------------
# Module-equivalent wrapper
# ---------------------------------------------------------------------------

def init_mha_params(key, input_dim, n_heads, query_dim=None, dtype=jnp.float32):
    """Deterministic synthetic parameters (shapes match the nn.Module __init__)."""
    query_dim = query_dim if query_dim is not None else input_dim
    k1, k2, k3, k4, k5, k6 = jax.random.split(key, 6)
    s_q = 1.0 / math.sqrt(query_dim)
    s_in = 1.0 / math.sqrt(input_dim)
    params = {
        # stored as (in, out) so the kernel does x @ W (== PyTorch x @ W^T)
        "q_w": jax.random.uniform(k1, (query_dim, input_dim), dtype, -s_q, s_q),
        "q_b": jax.random.uniform(k2, (input_dim,), dtype, -s_q, s_q),
        "kv_w": jax.random.uniform(k3, (input_dim, 2 * input_dim), dtype, -s_in, s_in),
        "kv_b": jax.random.uniform(k4, (2 * input_dim,), dtype, -s_in, s_in),
    }
    if n_heads > 1:
        params["out_w"] = jax.random.uniform(k5, (input_dim, query_dim), dtype, -s_in, s_in)
        params["out_b"] = jax.random.uniform(k6, (query_dim,), dtype, -s_in, s_in)
    return params


def multi_headed_attention(params, x_q, x_kv=None, *, input_dim, n_heads,
                           compute_dtype=jnp.bfloat16):
    """Forward pass equivalent to MultiHeadedAttention (standard attention, eval).

    compute_dtype controls only the MXU matmul inputs (bf16 default for
    v6e/v7x throughput); softmax, bias adds and accumulation stay in f32.
    """
    if x_kv is None:
        x_kv = x_q
    B, Mq, Dq = x_q.shape
    Bk, Mkv, Dkv = x_kv.shape
    assert Bk == B and Dkv == input_dim
    assert input_dim % n_heads == 0
    head_dim = input_dim // n_heads
    has_out_proj = n_heads > 1
    out_dim = Dq if has_out_proj else input_dim

    bt = _pick_block_batch(B, Mq, Mkv)
    grid = (B // bt,)

    # Parameter-side prep (tiny, one-off):
    #   * split fused kv weights (k/v activations never touch HBM),
    #   * fold the 1/sqrt(head_dim) softmax scale into q_w / q_b,
    #   * cast weights to the MXU compute dtype (halves DMA bytes + resident
    #     VMEM when bf16); biases stay f32 (added to f32 accumulators on the
    #     VPU, keeping the elementwise path f32 on v5e).
    scale = 1.0 / math.sqrt(head_dim)
    q_w = (params["q_w"] * scale).astype(compute_dtype)
    q_b = (params["q_b"] * scale).astype(jnp.float32).reshape(1, input_dim)
    k_w = params["kv_w"][:, :input_dim].astype(compute_dtype)
    v_w = params["kv_w"][:, input_dim:].astype(compute_dtype)
    k_b = params["kv_b"][:input_dim].astype(jnp.float32).reshape(1, input_dim)
    v_b = params["kv_b"][input_dim:].astype(jnp.float32).reshape(1, input_dim)

    kernel = functools.partial(
        _fused_mha_kernel, n_heads=n_heads, head_dim=head_dim, bt=bt,
        mq=Mq, mkv=Mkv, has_out_proj=has_out_proj, compute_dtype=compute_dtype)

    def resident(shape):
        # Same block index every grid step -> the weight stays VMEM-resident,
        # no re-DMA across the grid.
        # TODO(synk): on v7x (64 MiB VMEM/TC) with large D, add
        # pipeline_mode=pl.Buffered(1) here to single-buffer these
        # never-changing blocks.
        return pl.BlockSpec(shape, lambda i: (0,) * len(shape))

    in_specs = [
        pl.BlockSpec((bt, Mq, Dq), lambda i: (i, 0, 0)),
        pl.BlockSpec((bt, Mkv, input_dim), lambda i: (i, 0, 0)),
        resident((Dq, input_dim)), resident((1, input_dim)),
        resident((input_dim, input_dim)), resident((1, input_dim)),
        resident((input_dim, input_dim)), resident((1, input_dim)),
    ]
    inputs = [x_q, x_kv, q_w, q_b, k_w, k_b, v_w, v_b]
    if has_out_proj:
        in_specs += [resident((input_dim, out_dim)), resident((1, out_dim))]
        inputs += [params["out_w"].astype(compute_dtype),
                   params["out_b"].astype(jnp.float32).reshape(1, out_dim)]

    # VMEM budget: resident weights + double-buffered activation blocks +
    # ctx scratch + in-kernel temporaries, with 2x headroom, capped at 64 MiB
    # so the limit is valid on v7x (64 MiB/TC) as well as v5e/v6e (128 MiB).
    wdt = jnp.dtype(compute_dtype).itemsize
    xdt = x_q.dtype.itemsize
    w_bytes = (Dq * input_dim + 2 * input_dim * input_dim
               + (input_dim * out_dim if has_out_proj else 0)) * wdt
    act_bytes = 2 * bt * (Mq * Dq + Mkv * input_dim) * xdt
    out_bytes = 2 * bt * Mq * out_dim * xdt
    scratch_bytes = bt * Mq * input_dim * 4
    tmp_bytes = (3 * bt * max(Mq, Mkv) * input_dim + 3 * bt * Mq * Mkv) * 4
    est = 2 * (w_bytes + act_bytes + out_bytes + scratch_bytes + tmp_bytes)
    vmem_limit = int(min(64 * 2**20, max(16 * 2**20, est)))

    # TODO(synk): for long sequences, tile Mq / stream K,V flash-style on an
    # extra "arbitrary" grid axis instead of holding the full (Mq, Mkv) score
    # matrix per head; tabular-transformer sizes fit comfortably in VMEM.
    # TODO(synk): a fully lane-dense (B, Mq*out_dim) output layout would need
    # a minor-dims reshape Mosaic may reject; the per-step output block is
    # widened via row batching instead.
    return pl.pallas_call(
        kernel,
        out_shape=jax.ShapeDtypeStruct((B, Mq, out_dim), x_q.dtype),
        grid=grid,
        in_specs=in_specs,
        out_specs=pl.BlockSpec((bt, Mq, out_dim), lambda i: (i, 0, 0)),
        scratch_shapes=[pltpu.VMEM((bt, Mq, input_dim), jnp.float32)],
        compiler_params=pltpu.CompilerParams(
            dimension_semantics=("parallel",),
            vmem_limit_bytes=vmem_limit),
    )(*inputs)


# ---------------------------------------------------------------------------
# Pure-JAX reference for the correctness check
# ---------------------------------------------------------------------------

def reference_mha(params, x_q, x_kv=None, *, input_dim, n_heads):
    if x_kv is None:
        x_kv = x_q
    B, Mq, Dq = x_q.shape
    _, Mkv, _ = x_kv.shape
    head_dim = input_dim // n_heads
    q = x_q @ params["q_w"] + params["q_b"]
    kv = x_kv @ params["kv_w"] + params["kv_b"]
    k, v = kv[..., :input_dim], kv[..., input_dim:]
    rs = lambda t, M: t.reshape(B, M, n_heads, head_dim).transpose(0, 2, 1, 3)
    qh, kh, vh = rs(q, Mq), rs(k, Mkv), rs(v, Mkv)
    scores = jnp.einsum("bhsd,bhld->bhsl", qh, kh) / math.sqrt(head_dim)
    attn = jax.nn.softmax(scores, axis=-1)
    out = jnp.einsum("bhsl,bhld->bhsd", attn, vh)
    out = out.transpose(0, 2, 1, 3).reshape(B, Mq, input_dim)
    if n_heads > 1:
        out = out @ params["out_w"] + params["out_b"]
    return out


if __name__ == "__main__":
    B, M, INPUT_DIM, N_HEADS = 2, 8, 32, 4

    key = jax.random.PRNGKey(0)
    k_params, k_x = jax.random.split(key)
    params = init_mha_params(k_params, INPUT_DIM, N_HEADS)
    x_q = jax.random.normal(k_x, (B, M, INPUT_DIM), jnp.float32)

    ref = reference_mha(params, x_q, input_dim=INPUT_DIM, n_heads=N_HEADS)

    # Exact-ish check with f32 MXU compute.
    out_f32 = jax.block_until_ready(multi_headed_attention(
        params, x_q, input_dim=INPUT_DIM, n_heads=N_HEADS,
        compute_dtype=jnp.float32))
    assert out_f32.shape == (B, M, INPUT_DIM)
    assert jnp.allclose(out_f32, ref, atol=2e-3, rtol=2e-3), "f32 mismatch"

    # Default path: bf16 on the MXU, f32 softmax/accumulation (looser tol).
    out_bf16 = jax.block_until_ready(multi_headed_attention(
        params, x_q, input_dim=INPUT_DIM, n_heads=N_HEADS))
    assert out_bf16.shape == (B, M, INPUT_DIM)
    assert jnp.allclose(out_bf16, ref, atol=5e-2, rtol=5e-2), "bf16 mismatch"

    print("KERNEL_OK")
</pallas_src>

<mosaic_0001>
module attributes {stable_mosaic.version = 11 : i64} {
  func.func @_fused_mha_kernel(%arg0: i32, %arg1: memref<2x8x32xf32, #tpu.memory_space<vmem>>, %arg2: memref<2x8x32xf32, #tpu.memory_space<vmem>>, %arg3: memref<32x32xf32, #tpu.memory_space<vmem>>, %arg4: memref<1x32xf32, #tpu.memory_space<vmem>>, %arg5: memref<32x32xf32, #tpu.memory_space<vmem>>, %arg6: memref<1x32xf32, #tpu.memory_space<vmem>>, %arg7: memref<32x32xf32, #tpu.memory_space<vmem>>, %arg8: memref<1x32xf32, #tpu.memory_space<vmem>>, %arg9: memref<32x32xf32, #tpu.memory_space<vmem>>, %arg10: memref<1x32xf32, #tpu.memory_space<vmem>>, %arg11: memref<2x8x32xf32, #tpu.memory_space<vmem>>, %arg12: memref<2x8x32xf32, #tpu.memory_space<vmem>>) attributes {dimension_semantics = [#tpu.dimension_semantics<parallel>], iteration_bounds = array<i64: 1>, scalar_prefetch = 0 : i64, scratch_operands = 1 : i64, tpu.core_type = #tpu.core_type<tc>, window_params = [{transform_indices = @transform_0, window_bounds = array<i64: 2, 8, 32>}, {transform_indices = @transform_1, window_bounds = array<i64: 2, 8, 32>}, {pipeline_mode = #tpu.pipeline_mode<synchronous>, transform_indices = @transform_2, window_bounds = array<i64: 32, 32>}, {pipeline_mode = #tpu.pipeline_mode<synchronous>, transform_indices = @transform_3, window_bounds = array<i64: 1, 32>}, {pipeline_mode = #tpu.pipeline_mode<synchronous>, transform_indices = @transform_4, window_bounds = array<i64: 32, 32>}, {pipeline_mode = #tpu.pipeline_mode<synchronous>, transform_indices = @transform_5, window_bounds = array<i64: 1, 32>}, {pipeline_mode = #tpu.pipeline_mode<synchronous>, transform_indices = @transform_6, window_bounds = array<i64: 32, 32>}, {pipeline_mode = #tpu.pipeline_mode<synchronous>, transform_indices = @transform_7, window_bounds = array<i64: 1, 32>}, {pipeline_mode = #tpu.pipeline_mode<synchronous>, transform_indices = @transform_8, window_bounds = array<i64: 32, 32>}, {pipeline_mode = #tpu.pipeline_mode<synchronous>, transform_indices = @transform_9, window_bounds = array<i64: 1, 32>}, {transform_indices = @transform_10, window_bounds = array<i64: 2, 8, 32>}]} {
    %c0 = arith.constant 0 : index
    %c0_0 = arith.constant 0 : index
    %c0_1 = arith.constant 0 : index
    %0 = vector.load %arg1[%c0, %c0_0, %c0_1] : memref<2x8x32xf32, #tpu.memory_space<vmem>>, vector<2x8x32xf32>
    %1 = vector.shape_cast %0 : vector<2x8x32xf32> to vector<16x32xf32>
    %c0_2 = arith.constant 0 : index
    %c0_3 = arith.constant 0 : index
    %c0_4 = arith.constant 0 : index
    %2 = vector.load %arg2[%c0_2, %c0_3, %c0_4] : memref<2x8x32xf32, #tpu.memory_space<vmem>>, vector<2x8x32xf32>
    %3 = vector.shape_cast %2 : vector<2x8x32xf32> to vector<16x32xf32>
    %c0_5 = arith.constant 0 : index
    %c0_6 = arith.constant 0 : index
    %4 = vector.load %arg3[%c0_5, %c0_6] : memref<32x32xf32, #tpu.memory_space<vmem>>, vector<32x32xf32>
    %cst = arith.constant dense<0.000000e+00> : vector<16x32xf32>
    %5 = tpu.matmul %1, %4, %cst {dimension_numbers = #tpu.dot_dimension_numbers<[1], [0], [0], [1], [0, 0, 1, 1], [], []>} : vector<16x32xf32>, vector<32x32xf32>, vector<16x32xf32> -> vector<16x32xf32>
    %c0_7 = arith.constant 0 : index
    %c0_8 = arith.constant 0 : index
    %6 = vector.load %arg4[%c0_7, %c0_8] : memref<1x32xf32, #tpu.memory_space<vmem>>, vector<1x32xf32>
    %7 = vector.broadcast %6 : vector<1x32xf32> to vector<16x32xf32>
    %8 = arith.addf %5, %7 : vector<16x32xf32>
    %c0_9 = arith.constant 0 : index
    %c0_10 = arith.constant 0 : index
    %9 = vector.load %arg5[%c0_9, %c0_10] : memref<32x32xf32, #tpu.memory_space<vmem>>, vector<32x32xf32>
    %cst_11 = arith.constant dense<0.000000e+00> : vector<16x32xf32>
    %10 = tpu.matmul %3, %9, %cst_11 {dimension_numbers = #tpu.dot_dimension_numbers<[1], [0], [0], [1], [0, 0, 1, 1], [], []>} : vector<16x32xf32>, vector<32x32xf32>, vector<16x32xf32> -> vector<16x32xf32>
    %c0_12 = arith.constant 0 : index
    %c0_13 = arith.constant 0 : index
    %11 = vector.load %arg6[%c0_12, %c0_13] : memref<1x32xf32, #tpu.memory_space<vmem>>, vector<1x32xf32>
    %12 = vector.broadcast %11 : vector<1x32xf32> to vector<16x32xf32>
    %13 = arith.addf %10, %12 : vector<16x32xf32>
    %c0_14 = arith.constant 0 : index
    %c0_15 = arith.constant 0 : index
    %14 = vector.load %arg7[%c0_14, %c0_15] : memref<32x32xf32, #tpu.memory_space<vmem>>, vector<32x32xf32>
    %cst_16 = arith.constant dense<0.000000e+00> : vector<16x32xf32>
    %15 = tpu.matmul %3, %14, %cst_16 {dimension_numbers = #tpu.dot_dimension_numbers<[1], [0], [0], [1], [0, 0, 1, 1], [], []>} : vector<16x32xf32>, vector<32x32xf32>, vector<16x32xf32> -> vector<16x32xf32>
    %c0_17 = arith.constant 0 : index
    %c0_18 = arith.constant 0 : index
    %16 = vector.load %arg8[%c0_17, %c0_18] : memref<1x32xf32, #tpu.memory_space<vmem>>, vector<1x32xf32>
    %17 = vector.broadcast %16 : vector<1x32xf32> to vector<16x32xf32>
    %18 = arith.addf %15, %17 : vector<16x32xf32>
    %19 = vector.shape_cast %8 : vector<16x32xf32> to vector<2x8x32xf32>
    %20 = vector.shape_cast %13 : vector<16x32xf32> to vector<2x8x32xf32>
    %21 = vector.shape_cast %18 : vector<16x32xf32> to vector<2x8x32xf32>
    %22 = vector.extract_strided_slice %19 {offsets = [0, 0, 0], sizes = [2, 8, 8], strides = [1, 1, 1]} : vector<2x8x32xf32> to vector<2x8x8xf32>
    %23 = vector.extract_strided_slice %20 {offsets = [0, 0, 0], sizes = [2, 8, 8], strides = [1, 1, 1]} : vector<2x8x32xf32> to vector<2x8x8xf32>
    "tpu.trace_start"() <{level = 10 : i32, message = "bqd,bkd->bqk"}> : () -> ()
    %cst_19 = arith.constant dense<0.000000e+00> : vector<2x8x8xf32>
    %24 = tpu.matmul %22, %23, %cst_19 {dimension_numbers = #tpu.dot_dimension_numbers<[2], [2], [1], [1], [0, 0, 0, 1, 1, 1], [0], [0]>} : vector<2x8x8xf32>, vector<2x8x8xf32>, vector<2x8x8xf32> -> vector<2x8x8xf32>
    "tpu.trace_stop"() : () -> ()
    %cst_20 = arith.constant dense<0xFF800000> : vector<2x8xf32>
    %25 = vector.multi_reduction <maximumf>, %24, %cst_20 [2] : vector<2x8x8xf32> to vector<2x8xf32>
    %26 = vector.shape_cast %25 : vector<2x8xf32> to vector<2x8x1xf32>
    %27 = vector.broadcast %26 : vector<2x8x1xf32> to vector<2x8x8xf32>
    %28 = arith.subf %24, %27 : vector<2x8x8xf32>
    %29 = math.exp %28 : vector<2x8x8xf32>
    %cst_21 = arith.constant dense<0.000000e+00> : vector<2x8xf32>
    %30 = vector.multi_reduction <add>, %29, %cst_21 [2] : vector<2x8x8xf32> to vector<2x8xf32>
    %31 = vector.shape_cast %30 : vector<2x8xf32> to vector<2x8x1xf32>
    %32 = tpu.reciprocal %31 {approx = true} : vector<2x8x1xf32> -> vector<2x8x1xf32>
    %33 = arith.mulf %31, %32 : vector<2x8x1xf32>
    %cst_22 = arith.constant 2.000000e+00 : f32
    %34 = vector.broadcast %cst_22 : f32 to vector<2x8x1xf32>
    %35 = arith.subf %34, %33 : vector<2x8x1xf32>
    %36 = arith.mulf %32, %35 : vector<2x8x1xf32>
    %37 = vector.broadcast %36 : vector<2x8x1xf32> to vector<2x8x8xf32>
    %38 = arith.mulf %29, %37 : vector<2x8x8xf32>
    %39 = vector.extract_strided_slice %21 {offsets = [0, 0, 0], sizes = [2, 8, 8], strides = [1, 1, 1]} : vector<2x8x32xf32> to vector<2x8x8xf32>
    "tpu.trace_start"() <{level = 10 : i32, message = "bqk,bkd->bqd"}> : () -> ()
    %cst_23 = arith.constant dense<0.000000e+00> : vector<2x8x8xf32>
    %40 = tpu.matmul %38, %39, %cst_23 {dimension_numbers = #tpu.dot_dimension_numbers<[2], [1], [1], [2], [0, 0, 0, 1, 1, 2], [0], [0]>} : vector<2x8x8xf32>, vector<2x8x8xf32>, vector<2x8x8xf32> -> vector<2x8x8xf32>
    "tpu.trace_stop"() : () -> ()
    %c0_24 = arith.constant 0 : index
    %c0_25 = arith.constant 0 : index
    %c0_26 = arith.constant 0 : index
    %41 = vector.load %arg12[%c0_24, %c0_25, %c0_26] : memref<2x8x32xf32, #tpu.memory_space<vmem>>, vector<2x8x8xf32>
    tpu.vector_store %arg12[%c0_24, %c0_25, %c0_26], %40 {strides = array<i32>} : memref<2x8x32xf32, #tpu.memory_space<vmem>>, vector<2x8x8xf32>,
    %42 = vector.extract_strided_slice %19 {offsets = [0, 0, 8], sizes = [2, 8, 8], strides = [1, 1, 1]} : vector<2x8x32xf32> to vector<2x8x8xf32>
    %43 = vector.extract_strided_slice %20 {offsets = [0, 0, 8], sizes = [2, 8, 8], strides = [1, 1, 1]} : vector<2x8x32xf32> to vector<2x8x8xf32>
    "tpu.trace_start"() <{level = 10 : i32, message = "bqd,bkd->bqk"}> : () -> ()
    %cst_27 = arith.constant dense<0.000000e+00> : vector<2x8x8xf32>
    %44 = tpu.matmul %42, %43, %cst_27 {dimension_numbers = #tpu.dot_dimension_numbers<[2], [2], [1], [1], [0, 0, 0, 1, 1, 1], [0], [0]>} : vector<2x8x8xf32>, vector<2x8x8xf32>, vector<2x8x8xf32> -> vector<2x8x8xf32>
    "tpu.trace_stop"() : () -> ()
    %cst_28 = arith.constant dense<0xFF800000> : vector<2x8xf32>
    %45 = vector.multi_reduction <maximumf>, %44, %cst_28 [2] : vector<2x8x8xf32> to vector<2x8xf32>
    %46 = vector.shape_cast %45 : vector<2x8xf32> to vector<2x8x1xf32>
    %47 = vector.broadcast %46 : vector<2x8x1xf32> to vector<2x8x8xf32>
    %48 = arith.subf %44, %47 : vector<2x8x8xf32>
    %49 = math.exp %48 : vector<2x8x8xf32>
    %cst_29 = arith.constant dense<0.000000e+00> : vector<2x8xf32>
    %50 = vector.multi_reduction <add>, %49, %cst_29 [2] : vector<2x8x8xf32> to vector<2x8xf32>
    %51 = vector.shape_cast %50 : vector<2x8xf32> to vector<2x8x1xf32>
    %52 = tpu.reciprocal %51 {approx = true} : vector<2x8x1xf32> -> vector<2x8x1xf32>
    %53 = arith.mulf %51, %52 : vector<2x8x1xf32>
    %cst_30 = arith.constant 2.000000e+00 : f32
    %54 = vector.broadcast %cst_30 : f32 to vector<2x8x1xf32>
    %55 = arith.subf %54, %53 : vector<2x8x1xf32>
    %56 = arith.mulf %52, %55 : vector<2x8x1xf32>
    %57 = vector.broadcast %56 : vector<2x8x1xf32> to vector<2x8x8xf32>
    %58 = arith.mulf %49, %57 : vector<2x8x8xf32>
    %59 = vector.extract_strided_slice %21 {offsets = [0, 0, 8], sizes = [2, 8, 8], strides = [1, 1, 1]} : vector<2x8x32xf32> to vector<2x8x8xf32>
    "tpu.trace_start"() <{level = 10 : i32, message = "bqk,bkd->bqd"}> : () -> ()
    %cst_31 = arith.constant dense<0.000000e+00> : vector<2x8x8xf32>
    %60 = tpu.matmul %58, %59, %cst_31 {dimension_numbers = #tpu.dot_dimension_numbers<[2], [1], [1], [2], [0, 0, 0, 1, 1, 2], [0], [0]>} : vector<2x8x8xf32>, vector<2x8x8xf32>, vector<2x8x8xf32> -> vector<2x8x8xf32>
    "tpu.trace_stop"() : () -> ()
    %c0_32 = arith.constant 0 : index
    %c0_33 = arith.constant 0 : index
    %c8 = arith.constant 8 : index
    %61 = vector.load %arg12[%c0_32, %c0_33, %c8] : memref<2x8x32xf32, #tpu.memory_space<vmem>>, vector<2x8x8xf32>
    tpu.vector_store %arg12[%c0_32, %c0_33, %c8], %60 {strides = array<i32>} : memref<2x8x32xf32, #tpu.memory_space<vmem>>, vector<2x8x8xf32>,
    %62 = vector.extract_strided_slice %19 {offsets = [0, 0, 16], sizes = [2, 8, 8], strides = [1, 1, 1]} : vector<2x8x32xf32> to vector<2x8x8xf32>
    %63 = vector.extract_strided_slice %20 {offsets = [0, 0, 16], sizes = [2, 8, 8], strides = [1, 1, 1]} : vector<2x8x32xf32> to vector<2x8x8xf32>
    "tpu.trace_start"() <{level = 10 : i32, message = "bqd,bkd->bqk"}> : () -> ()
    %cst_34 = arith.constant dense<0.000000e+00> : vector<2x8x8xf32>
    %64 = tpu.matmul %62, %63, %cst_34 {dimension_numbers = #tpu.dot_dimension_numbers<[2], [2], [1], [1], [0, 0, 0, 1, 1, 1], [0], [0]>} : vector<2x8x8xf32>, vector<2x8x8xf32>, vector<2x8x8xf32> -> vector<2x8x8xf32>
    "tpu.trace_stop"() : () -> ()
    %cst_35 = arith.constant dense<0xFF800000> : vector<2x8xf32>
    %65 = vector.multi_reduction <maximumf>, %64, %cst_35 [2] : vector<2x8x8xf32> to vector<2x8xf32>
    %66 = vector.shape_cast %65 : vector<2x8xf32> to vector<2x8x1xf32>
    %67 = vector.broadcast %66 : vector<2x8x1xf32> to vector<2x8x8xf32>
    %68 = arith.subf %64, %67 : vector<2x8x8xf32>
    %69 = math.exp %68 : vector<2x8x8xf32>
    %cst_36 = arith.constant dense<0.000000e+00> : vector<2x8xf32>
    %70 = vector.multi_reduction <add>, %69, %cst_36 [2] : vector<2x8x8xf32> to vector<2x8xf32>
    %71 = vector.shape_cast %70 : vector<2x8xf32> to vector<2x8x1xf32>
    %72 = tpu.reciprocal %71 {approx = true} : vector<2x8x1xf32> -> vector<2x8x1xf32>
    %73 = arith.mulf %71, %72 : vector<2x8x1xf32>
    %cst_37 = arith.constant 2.000000e+00 : f32
    %74 = vector.broadcast %cst_37 : f32 to vector<2x8x1xf32>
    %75 = arith.subf %74, %73 : vector<2x8x1xf32>
    %76 = arith.mulf %72, %75 : vector<2x8x1xf32>
    %77 = vector.broadcast %76 : vector<2x8x1xf32> to vector<2x8x8xf32>
    %78 = arith.mulf %69, %77 : vector<2x8x8xf32>
    %79 = vector.extract_strided_slice %21 {offsets = [0, 0, 16], sizes = [2, 8, 8], strides = [1, 1, 1]} : vector<2x8x32xf32> to vector<2x8x8xf32>
    "tpu.trace_start"() <{level = 10 : i32, message = "bqk,bkd->bqd"}> : () -> ()
    %cst_38 = arith.constant dense<0.000000e+00> : vector<2x8x8xf32>
    %80 = tpu.matmul %78, %79, %cst_38 {dimension_numbers = #tpu.dot_dimension_numbers<[2], [1], [1], [2], [0, 0, 0, 1, 1, 2], [0], [0]>} : vector<2x8x8xf32>, vector<2x8x8xf32>, vector<2x8x8xf32> -> vector<2x8x8xf32>
    "tpu.trace_stop"() : () -> ()
    %c0_39 = arith.constant 0 : index
    %c0_40 = arith.constant 0 : index
    %c16 = arith.constant 16 : index
    %81 = vector.load %arg12[%c0_39, %c0_40, %c16] : memref<2x8x32xf32, #tpu.memory_space<vmem>>, vector<2x8x8xf32>
    tpu.vector_store %arg12[%c0_39, %c0_40, %c16], %80 {strides = array<i32>} : memref<2x8x32xf32, #tpu.memory_space<vmem>>, vector<2x8x8xf32>,
    %82 = vector.extract_strided_slice %19 {offsets = [0, 0, 24], sizes = [2, 8, 8], strides = [1, 1, 1]} : vector<2x8x32xf32> to vector<2x8x8xf32>
    %83 = vector.extract_strided_slice %20 {offsets = [0, 0, 24], sizes = [2, 8, 8], strides = [1, 1, 1]} : vector<2x8x32xf32> to vector<2x8x8xf32>
    "tpu.trace_start"() <{level = 10 : i32, message = "bqd,bkd->bqk"}> : () -> ()
    %cst_41 = arith.constant dense<0.000000e+00> : vector<2x8x8xf32>
    %84 = tpu.matmul %82, %83, %cst_41 {dimension_numbers = #tpu.dot_dimension_numbers<[2], [2], [1], [1], [0, 0, 0, 1, 1, 1], [0], [0]>} : vector<2x8x8xf32>, vector<2x8x8xf32>, vector<2x8x8xf32> -> vector<2x8x8xf32>
    "tpu.trace_stop"() : () -> ()
    %cst_42 = arith.constant dense<0xFF800000> : vector<2x8xf32>
    %85 = vector.multi_reduction <maximumf>, %84, %cst_42 [2] : vector<2x8x8xf32> to vector<2x8xf32>
    %86 = vector.shape_cast %85 : vector<2x8xf32> to vector<2x8x1xf32>
    %87 = vector.broadcast %86 : vector<2x8x1xf32> to vector<2x8x8xf32>
    %88 = arith.subf %84, %87 : vector<2x8x8xf32>
    %89 = math.exp %88 : vector<2x8x8xf32>
    %cst_43 = arith.constant dense<0.000000e+00> : vector<2x8xf32>
    %90 = vector.multi_reduction <add>, %89, %cst_43 [2] : vector<2x8x8xf32> to vector<2x8xf32>
    %91 = vector.shape_cast %90 : vector<2x8xf32> to vector<2x8x1xf32>
    %92 = tpu.reciprocal %91 {approx = true} : vector<2x8x1xf32> -> vector<2x8x1xf32>
    %93 = arith.mulf %91, %92 : vector<2x8x1xf32>
    %cst_44 = arith.constant 2.000000e+00 : f32
    %94 = vector.broadcast %cst_44 : f32 to vector<2x8x1xf32>
    %95 = arith.subf %94, %93 : vector<2x8x1xf32>
    %96 = arith.mulf %92, %95 : vector<2x8x1xf32>
    %97 = vector.broadcast %96 : vector<2x8x1xf32> to vector<2x8x8xf32>
    %98 = arith.mulf %89, %97 : vector<2x8x8xf32>
    %99 = vector.extract_strided_slice %21 {offsets = [0, 0, 24], sizes = [2, 8, 8], strides = [1, 1, 1]} : vector<2x8x32xf32> to vector<2x8x8xf32>
    "tpu.trace_start"() <{level = 10 : i32, message = "bqk,bkd->bqd"}> : () -> ()
    %cst_45 = arith.constant dense<0.000000e+00> : vector<2x8x8xf32>
    %100 = tpu.matmul %98, %99, %cst_45 {dimension_numbers = #tpu.dot_dimension_numbers<[2], [1], [1], [2], [0, 0, 0, 1, 1, 2], [0], [0]>} : vector<2x8x8xf32>, vector<2x8x8xf32>, vector<2x8x8xf32> -> vector<2x8x8xf32>
    "tpu.trace_stop"() : () -> ()
    %c0_46 = arith.constant 0 : index
    %c0_47 = arith.constant 0 : index
    %c24 = arith.constant 24 : index
    %101 = vector.load %arg12[%c0_46, %c0_47, %c24] : memref<2x8x32xf32, #tpu.memory_space<vmem>>, vector<2x8x8xf32>
    tpu.vector_store %arg12[%c0_46, %c0_47, %c24], %100 {strides = array<i32>} : memref<2x8x32xf32, #tpu.memory_space<vmem>>, vector<2x8x8xf32>,
    %c0_48 = arith.constant 0 : index
    %c0_49 = arith.constant 0 : index
    %c0_50 = arith.constant 0 : index
    %102 = vector.load %arg12[%c0_48, %c0_49, %c0_50] : memref<2x8x32xf32, #tpu.memory_space<vmem>>, vector<2x8x32xf32>
    %103 = vector.shape_cast %102 : vector<2x8x32xf32> to vector<16x32xf32>
    %c0_51 = arith.constant 0 : index
    %c0_52 = arith.constant 0 : index
    %104 = vector.load %arg9[%c0_51, %c0_52] : memref<32x32xf32, #tpu.memory_space<vmem>>, vector<32x32xf32>
    %cst_53 = arith.constant dense<0.000000e+00> : vector<16x32xf32>
    %105 = tpu.matmul %103, %104, %cst_53 {dimension_numbers = #tpu.dot_dimension_numbers<[1], [0], [0], [1], [0, 0, 1, 1], [], []>} : vector<16x32xf32>, vector<32x32xf32>, vector<16x32xf32> -> vector<16x32xf32>
    %c0_54 = arith.constant 0 : index
    %c0_55 = arith.constant 0 : index
    %106 = vector.load %arg10[%c0_54, %c0_55] : memref<1x32xf32, #tpu.memory_space<vmem>>, vector<1x32xf32>
    %107 = vector.broadcast %106 : vector<1x32xf32> to vector<16x32xf32>
    %108 = arith.addf %105, %107 : vector<16x32xf32>
    %109 = vector.shape_cast %108 : vector<16x32xf32> to vector<2x8x32xf32>
    %c0_56 = arith.constant 0 : index
    %c0_57 = arith.constant 0 : index
    %c0_58 = arith.constant 0 : index
    %110 = vector.load %arg11[%c0_56, %c0_57, %c0_58] : memref<2x8x32xf32, #tpu.memory_space<vmem>>, vector<2x8x32xf32>
    tpu.vector_store %arg11[%c0_56, %c0_57, %c0_58], %109 {strides = array<i32>} : memref<2x8x32xf32, #tpu.memory_space<vmem>>, vector<2x8x32xf32>,
    return
  }
  func.func @transform_0(%arg0: i32) -> (i32, i32, i32) {
    %c0_i32 = arith.constant 0 : i32
    %c0_i32_0 = arith.constant 0 : i32
    %c0_i32_1 = arith.constant 0 : i32
    return %arg0, %c0_i32, %c0_i32_0 : i32, i32, i32
  }
  func.func @transform_1(%arg0: i32) -> (i32, i32, i32) {
    %c0_i32 = arith.constant 0 : i32
    %c0_i32_0 = arith.constant 0 : i32
    %c0_i32_1 = arith.constant 0 : i32
    return %arg0, %c0_i32, %c0_i32_0 : i32, i32, i32
  }
  func.func @transform_2(%arg0: i32) -> (i32, i32) {
    %c0_i32 = arith.constant 0 : i32
    %c0_i32_0 = arith.constant 0 : i32
    %c0_i32_1 = arith.constant 0 : i32
    return %c0_i32, %c0_i32_0 : i32, i32
  }
  func.func @transform_3(%arg0: i32) -> (i32, i32) {
    %c0_i32 = arith.constant 0 : i32
    %c0_i32_0 = arith.constant 0 : i32
    %c0_i32_1 = arith.constant 0 : i32
    return %c0_i32, %c0_i32_0 : i32, i32
  }
  func.func @transform_4(%arg0: i32) -> (i32, i32) {
    %c0_i32 = arith.constant 0 : i32
    %c0_i32_0 = arith.constant 0 : i32
    %c0_i32_1 = arith.constant 0 : i32
    return %c0_i32, %c0_i32_0 : i32, i32
  }
  func.func @transform_5(%arg0: i32) -> (i32, i32) {
    %c0_i32 = arith.constant 0 : i32
    %c0_i32_0 = arith.constant 0 : i32
    %c0_i32_1 = arith.constant 0 : i32
    return %c0_i32, %c0_i32_0 : i32, i32
  }
  func.func @transform_6(%arg0: i32) -> (i32, i32) {
    %c0_i32 = arith.constant 0 : i32
    %c0_i32_0 = arith.constant 0 : i32
    %c0_i32_1 = arith.constant 0 : i32
    return %c0_i32, %c0_i32_0 : i32, i32
  }
  func.func @transform_7(%arg0: i32) -> (i32, i32) {
    %c0_i32 = arith.constant 0 : i32
    %c0_i32_0 = arith.constant 0 : i32
    %c0_i32_1 = arith.constant 0 : i32
    return %c0_i32, %c0_i32_0 : i32, i32
  }
  func.func @transform_8(%arg0: i32) -> (i32, i32) {
    %c0_i32 = arith.constant 0 : i32
    %c0_i32_0 = arith.constant 0 : i32
    %c0_i32_1 = arith.constant 0 : i32
    return %c0_i32, %c0_i32_0 : i32, i32
  }
  func.func @transform_9(%arg0: i32) -> (i32, i32) {
    %c0_i32 = arith.constant 0 : i32
    %c0_i32_0 = arith.constant 0 : i32
    %c0_i32_1 = arith.constant 0 : i32
    return %c0_i32, %c0_i32_0 : i32, i32
  }
  func.func @transform_10(%arg0: i32) -> (i32, i32, i32) {
    %c0_i32 = arith.constant 0 : i32
    %c0_i32_0 = arith.constant 0 : i32
    %c0_i32_1 = arith.constant 0 : i32
    return %arg0, %c0_i32, %c0_i32_0 : i32, i32, i32
  }
}

</mosaic_0001>

<bundles_post_ra>
// kernel: tpu_custom_call.1
= control target key start
LH: loop header
LB: loop body
LE: loop exit
PB: predicated region body
PF: predicated region fallthrough
CT: control target
= control target key end

     0   :  { %15 = vsyncpa [#allocation4], 0  ;;  %s2714_s0 = inlined_call_operand.hbm [shape: f32[2,8,32], index: 0, kind: input, shape index: {}]   ;;  %s2715_s1 = inlined_call_operand.hbm [shape: f32[2,8,32], index: 1, kind: input, shape index: {}]   ;;  %s2716_s2 = inlined_call_operand.hbm [shape: f32[32,32], index: 2, kind: input, shape index: {}]   ;;  %s2717_s3 = inlined_call_operand.vmem [shape: f32[1,32], index: 3, kind: input, shape index: {}]   ;;  %s2718_s4 = inlined_call_operand.hbm [shape: f32[32,32], index: 4, kind: input, shape index: {}]   ;;  %s2719_s5 = inlined_call_operand.vmem [shape: f32[1,32], index: 5, kind: input, shape index: {}]   ;;  %s2720_s6 = inlined_call_operand.hbm [shape: f32[32,32], index: 6, kind: input, shape index: {}]   ;;  %s2721_s7 = inlined_call_operand.vmem [shape: f32[1,32], index: 7, kind: input, shape index: {}]   ;;  %s2722_s8 = inlined_call_operand.hbm [shape: f32[32,32], index: 8, kind: input, shape index: {}]   ;;  %s2723_s9 = inlined_call_operand.vmem [shape: f32[1,32], index: 9, kind: input, shape index: {}]   ;;  %s2724_s10 = inlined_call_operand.hbm [shape: f32[2,8,32], index: 10, kind: output, shape index: {}]  }
   0x1   :  { %16 = vsyncpa [#allocation7], 0 }
   0x2   :  { %17 = vsyncpa [#allocation10], 0 }
   0x3   :  { %18 = vsyncpa [#allocation13], 0 }
   0x4   :  { %19 = vsyncpa [#allocation5], 0  ;;  %s2341_s13 = smov [#allocation6]   ;;  %s2342_s15 = smov [#allocation9]  }
   0x5   :  { %s37_s14 = sshll.u32 %s2341_s13, 4  ;;  %s63_s16 = sshll.u32 %s2342_s15, 4  ;;  %s38_s14 = int_to_ptr.vmem [resolvable:$true] %s37_s14  ;;  %s2412_s16 = int_to_ptr.vmem [resolvable:$true] %s63_s16 }
   0x6   :  { %s2177_s19 = scalar_lea.hbm %s2715_s1, 256 }
   0x7   :  { %p2178_p0 = scmp.ne.s32.totalorder %s2715_s1, %s2177_s19  ;;  %p2181_p1 = scmp.lt.u32.totalorder %s2177_s19, %s2715_s1 }
   0x9   :  { %p2183_p2 = pnand %p2181_p1, %p2178_p0 }
   0xb   :  { %2186 = shalt.err (!%p2183_p2)
}
   0xc   :  { %s2187_s24 = scalar_lea.vmem %s38_s14, 256  ;;  %p2192_p4 = scmp.lt.s32.totalorder %s38_s14, %s38_s14 }
   0xd   :  { %p2188_p3 = scmp.ne.s32.totalorder %s38_s14, %s2187_s24  ;;  %p2193_p5 = scmp.lt.s32.totalorder %s2187_s24, %s2187_s24 }
   0xf   :  { %p2194_p6 = por %p2193_p5, %p2192_p4 }
  0x11   :  { %p2195_p7 = pnand %p2194_p6, %p2188_p3 }
  0x13   :  { %2198 = shalt.err (!%p2195_p7)
}
  0x14   :  { %s2343_s25 = smov 128   ;;  %s2344_s26 = smov 8  }
  0x15   :  { %43 = dma.hbm_to_vmem [thread:$0]  %s2715_s1, 256, %s38_s14, [#allocation7], %s2343_s25, %s2343_s25, %s2344_s26  }
  0x16   :  { %s2199_s11 = scalar_lea.hbm %s2718_s4, 512 }
  0x17   :  { %p2200_p8 = scmp.ne.s32.totalorder %s2718_s4, %s2199_s11  ;;  %p2203_p9 = scmp.lt.u32.totalorder %s2199_s11, %s2718_s4 }
  0x19   :  { %p2205_p10 = pnand %p2203_p9, %p2200_p8 }
  0x1b   :  { %2208 = shalt.err (!%p2205_p10)
}
  0x1c   :  { %s2209_s18 = scalar_lea.vmem %s2412_s16, 512  ;;  %p2214_p12 = scmp.lt.s32.totalorder %s2412_s16, %s2412_s16 }
  0x1d   :  { %p2210_p11 = scmp.ne.s32.totalorder %s2412_s16, %s2209_s18  ;;  %p2215_p13 = scmp.lt.s32.totalorder %s2209_s18, %s2209_s18 }
  0x1f   :  { %p2216_p0 = por %p2215_p13, %p2214_p12 }
  0x21   :  { %p2217_p1 = pnand %p2216_p0, %p2210_p11 }
  0x23   :  { %2220 = shalt.err (!%p2217_p1)
}
  0x24   :  { %69 = dma.hbm_to_vmem [thread:$0]  %s2718_s4, 512, %s2412_s16, [#allocation10], %s2343_s25, %s2343_s25, %s2344_s26  }
  0x25   :  { %s2345_s19 = smov [#allocation3]   ;;  %s2346_s21 = smov [#allocation8]  }
  0x26   :  { %s25_s20 = sshll.u32 %s2345_s19, 4  ;;  %s49_s22 = sshll.u32 %s2346_s21, 4  ;;  %s26_s20 = int_to_ptr.vmem [resolvable:$true] %s25_s20  ;;  %s2449_s22 = int_to_ptr.vmem [resolvable:$true] %s49_s22 }
  0x27   :  { %s2221_s27 = scalar_lea.hbm %s2714_s0, 256 }
  0x28   :  { %p2222_p2 = scmp.ne.s32.totalorder %s2714_s0, %s2221_s27  ;;  %p2225_p3 = scmp.lt.u32.totalorder %s2221_s27, %s2714_s0 }
  0x2a   :  { %p2227_p4 = pnand %p2225_p3, %p2222_p2 }
  0x2c   :  { %2230 = shalt.err (!%p2227_p4)
}
  0x2d   :  { %s2231_s4 = scalar_lea.vmem %s26_s20, 256  ;;  %p2236_p6 = scmp.lt.s32.totalorder %s26_s20, %s26_s20 }
  0x2e   :  { %p2232_p5 = scmp.ne.s32.totalorder %s26_s20, %s2231_s4  ;;  %p2237_p7 = scmp.lt.s32.totalorder %s2231_s4, %s2231_s4 }
  0x30   :  { %p2238_p8 = por %p2237_p7, %p2236_p6 }
  0x32   :  { %p2239_p9 = pnand %p2238_p8, %p2232_p5 }
  0x34   :  { %2242 = shalt.err (!%p2239_p9)
}
  0x35   :  { %31 = dma.hbm_to_vmem [thread:$0]  %s2714_s0, 256, %s26_s20, [#allocation4], %s2343_s25, %s2343_s25, %s2344_s26  }
  0x36   :  { %s2243_s17 = scalar_lea.hbm %s2716_s2, 512 }
  0x37   :  { %p2244_p10 = scmp.ne.s32.totalorder %s2716_s2, %s2243_s17  ;;  %p2247_p11 = scmp.lt.u32.totalorder %s2243_s17, %s2716_s2 }
  0x39   :  { %p2249_p12 = pnand %p2247_p11, %p2244_p10 }
  0x3b   :  { %2252 = shalt.err (!%p2249_p12)
}
  0x3c   :  { %s2253_s21 = scalar_lea.vmem %s2449_s22, 512  ;;  %p2258_p0 = scmp.lt.s32.totalorder %s2449_s22, %s2449_s22 }
  0x3d   :  { %p2254_p13 = scmp.ne.s32.totalorder %s2449_s22, %s2253_s21  ;;  %p2259_p1 = scmp.lt.s32.totalorder %s2253_s21, %s2253_s21 }
  0x3f   :  { %p2260_p2 = por %p2259_p1, %p2258_p0 }
  0x41   :  { %p2261_p3 = pnand %p2260_p2, %p2254_p13 }
  0x43   :  { %2264 = shalt.err (!%p2261_p3)
}
  0x44   :  { %55 = dma.hbm_to_vmem [thread:$0]  %s2716_s2, 512, %s2449_s22, [#allocation7], %s2343_s25, %s2343_s25, %s2344_s26  }
  0x45   :  { %s2347_s23 = smov [#allocation11]   ;;  %s2348_s27 = smov [#allocation12]  }
  0x46   :  { %s77_s24 = sshll.u32 %s2347_s23, 4  ;;  %s91_s28 = sshll.u32 %s2348_s27, 4  ;;  %s78_s24 = int_to_ptr.vmem [resolvable:$true] %s77_s24  ;;  %s2486_s28 = int_to_ptr.vmem [resolvable:$true] %s91_s28 }
  0x47   :  { %s2265_s11 = scalar_lea.hbm %s2720_s6, 512 }
  0x48   :  { %p2266_p4 = scmp.ne.s32.totalorder %s2720_s6, %s2265_s11  ;;  %p2269_p5 = scmp.lt.u32.totalorder %s2265_s11, %s2720_s6 }
  0x4a   :  { %p2271_p6 = pnand %p2269_p5, %p2266_p4 }
  0x4c   :  { %2274 = shalt.err (!%p2271_p6)
}
  0x4d   :  { %s2275_s2 = scalar_lea.vmem %s78_s24, 512  ;;  %p2280_p8 = scmp.lt.s32.totalorder %s78_s24, %s78_s24 }
  0x4e   :  { %p2276_p7 = scmp.ne.s32.totalorder %s78_s24, %s2275_s2  ;;  %p2281_p9 = scmp.lt.s32.totalorder %s2275_s2, %s2275_s2 }
  0x50   :  { %p2282_p10 = por %p2281_p9, %p2280_p8 }
  0x52   :  { %p2283_p11 = pnand %p2282_p10, %p2276_p7 }
  0x54   :  { %2286 = shalt.err (!%p2283_p11)
}
  0x55   :  { %83 = dma.hbm_to_vmem [thread:$0]  %s2720_s6, 512, %s78_s24, [#allocation10], %s2343_s25, %s2343_s25, %s2344_s26  }
  0x56   :  { %s2287_s1 = scalar_lea.hbm %s2722_s8, 512 }
  0x57   :  { %p2288_p12 = scmp.ne.s32.totalorder %s2722_s8, %s2287_s1  ;;  %p2291_p13 = scmp.lt.u32.totalorder %s2287_s1, %s2722_s8 }
  0x59   :  { %p2293_p0 = pnand %p2291_p13, %p2288_p12 }
  0x5b   :  { %2296 = shalt.err (!%p2293_p0)
}
  0x5c   :  { %s2297_s20 = scalar_lea.vmem %s2486_s28, 512  ;;  %p2302_p2 = scmp.lt.s32.totalorder %s2486_s28, %s2486_s28 }
  0x5d   :  { %p2298_p1 = scmp.ne.s32.totalorder %s2486_s28, %s2297_s20  ;;  %p2303_p3 = scmp.lt.s32.totalorder %s2297_s20, %s2297_s20 }
  0x5f   :  { %p2304_p4 = por %p2303_p3, %p2302_p2 }
  0x61   :  { %p2305_p5 = pnand %p2304_p4, %p2298_p1 }
  0x63   :  { %2308 = shalt.err (!%p2305_p5)
}
  0x64   :  { %97 = dma.hbm_to_vmem [thread:$0]  %s2722_s8, 512, %s2486_s28, [#allocation13], %s2343_s25, %s2343_s25, %s2344_s26  }
  0x65   :  { %2331 = dma.done.wait [#allocation4], 256  }
  0x66   :  { %2332 = vsyncadd [#allocation4], 4294967040 }
  0x67   :  { %2333 = dma.done.wait [#allocation7], 768  }
  0x68   :  { %2334 = vsyncadd [#allocation7], 4294966528 }
  0x69   :  { %2335 = dma.done.wait [#allocation10], 1024  }
  0x6a   :  { %2336 = vsyncadd [#allocation10], 4294966272 }
  0x6b   :  { %2337 = dma.done.wait [#allocation13], 512  }
  0x6c   :  { %2338 = vsyncadd [#allocation13], 4294966784  ;;  %v215_v0 = vld [vmem:[#allocation9] sm:$0xff]  ;;  %v216_v1 = vld [vmem:[#allocation9 + $0x8] sm:$0xff]  ;;  %vm133_vm0 = vcmask 261120   ;;  %v2349_v16 = vmov 0.0  }
  0x6d   :  { %v122_v2 = vld [vmem:[#allocation8] sm:$0xff]  ;;  %v2105_v3 = vpack.c.bf16 %v216_v1, %v215_v0  ;;  %v123_v4 = vld [vmem:[#allocation8 + $0x8] sm:$0xff]  ;;  %v217_v5 = vld [vmem:[#allocation9 + $0x10] sm:$0xff]  ;;  %vm2350_vm1 = vmmov 0   ;;  %vm393_vm2 = vcmask 64512   ;;  %s2351_s29 = smov 120  }
  0x6e   :  { %v218_v6 = vld [vmem:[#allocation9 + $0x18] sm:$0xff]  ;;  %v2097_v7 = vpack.c.bf16 %v123_v4, %v122_v2  ;;  %v124_v9 = vld [vmem:[#allocation8 + $0x10] sm:$0xff]  ;;  %v118_v13 = vld [vmem:[#allocation3] sm:$0xff]  ;;  %s2353_s30 = smov 104   ;;  %s2354_s11 = smov 16   ;;  %vm1068_vm3 = vcmask 130112  }
  0x6f   :  { %v2109_v8 = vpack.c.bf16 %v218_v6, %v217_v5  ;;  %v125_v10 = vld [vmem:[#allocation8 + $0x18] sm:$0xff]  ;;  %v120_v11 = vld [vmem:[#allocation6] sm:$0xff]  ;;  %2106 = vmatprep.subr.bf16.mxu1 %v2105_v3  ;;  %1981 = vmatprep.mubr.msk.f32.mxu0 %vm133_vm0, %v118_v13  ;;  %v119_v15 = vld [vmem:[#allocation3 + $0x8] sm:$0xff]  ;;  %vm1415_vm4 = vcmask 195712   ;;  %s2355_s4 = smov 24   ;;  %vm1762_vm5 = vcmask 261312  }
  0x70   :  { %v2101_v12 = vpack.c.bf16 %v125_v10, %v124_v9  ;;  %1992 = vmatprep.mubr.msk.f32.mxu1 %vm133_vm0, %v120_v11  ;;  %2108 = vmatpush3.bf16.msra.mxu1 %v2105_v3  ;;  %v121_v14 = vld [vmem:[#allocation6 + $0x8] sm:$0xff]  ;;  %v1884_v17 = vld [vmem:[%s2719_s5] ss:$0 sm:$0xff]  ;;  %v307_v27 = vld [vmem:[#allocation11] sm:$0xff]  ;;  %s2356_s13 = smov [#allocation14]  }
  0x71   :  { %2098 = vmatprep.subr.bf16.mxu0 %v2097_v7  ;;  %2110 = vmatprep.subr.bf16.mxu1 %v2109_v8  ;;  %v1881_v19 = vld [vmem:[%s2717_s3] ss:$0 sm:$0xff]  ;;  %v308_v28 = vld [vmem:[#allocation11 + $0x8] sm:$0xff]  ;;  %v310_v31 = vld [vmem:[#allocation11 + $0x18] sm:$0xff]  ;;  %s1866_s2 = sshll.u32 %s2356_s13, 4  ;;  %s1867_s2 = int_to_ptr.vmem [resolvable:$true] %s1866_s2 }
  0x72   :  { %2100 = vmatpush3.bf16.msra.mxu0 %v2097_v7  ;;  %v309_v29 = vld [vmem:[#allocation11 + $0x10] sm:$0xff]  ;;  %v2113_v30 = vpack.c.bf16 %v308_v28, %v307_v27  ;;  %s2309_s22 = scalar_lea.vmem %s1867_s2, 256  ;;  %p2314_p7 = scmp.lt.s32.totalorder %s1867_s2, %s1867_s2 }
  0x73   :  { %2102 = vmatprep.subr.bf16.mxu0 %v2101_v12  ;;  %v2117_v32 = vpack.c.bf16 %v310_v31, %v309_v29  ;;  %v1887_v51 = vld [vmem:[%s2721_s7] ss:$0 sm:$0xff]  ;;  %s2352_s7 = smov 112   ;;  %p2310_p6 = scmp.ne.s32.totalorder %s1867_s2, %s2309_s22 }
  0x74   :  { %2112 = vmatpush3.bf16.msra.mxu1 %v2109_v8  ;;  %p2315_p8 = scmp.lt.s32.totalorder %s2309_s22, %s2309_s22 }
  0x75   :  { %2006 = vmatprep.subr.mxu1 %v2349_v16 }
  0x76   :  { %2104 = vmatpush3.bf16.msra.mxu0 %v2101_v12  ;;  %p2316_p9 = por %p2315_p8, %p2314_p7 }
  0x77   :  { %1993 = vmatmul.mubr.msk.f32.vlgmr.msra.gmra.mrb[0].mxu1 %vm133_vm0, %v121_v14  ;;  %2114 = vmatprep.subr.bf16.mxu0 %v2113_v30 }
  0x78   :  { %2008 = vmatprep.mubr.msk.f32.mxu1 %vm2350_vm1, %v2349_v16  ;;  %p2317_p10 = pnand %p2316_p9, %p2310_p6 }
  0x79   :  { %1982 = vmatmul.mubr.msk.f32.vlgmr.msra.gmra.mrb[0].mxu0 %vm133_vm0, %v119_v15 }
  0x7a   :  { %2003 = vmatprep.mubr.msk.f32.mxu0 %vm133_vm0, %v120_v11  ;;  %2116 = vmatpush3.bf16.msra.mxu0 %v2113_v30 }
  0x7b   :  { %2118 = vmatprep.subr.bf16.mxu0 %v2117_v32 }
  0x7e   :  { %2120 = vmatpush3.bf16.msra.mxu0 %v2117_v32 }
  0x7f   :  { %2026 = vmatprep.subr.mxu0 %v2349_v16 }
  0x81   :  { %2004 = vmatmul.mubr.msk.f32.vlgmr.msra.gmra.mrb[2].mxu0 %vm133_vm0, %v121_v14 }
  0x82   :  { %2028 = vmatprep.mubr.msk.f32.mxu0 %vm2350_vm1, %v2349_v16 }
 0x14a   :  { %v1994_v18 = vpop.f32.mrb[0].mxu1 }
 0x14b   :  { %v2537_v20 = vadd.f32 %v1994_v18, %v1884_v17  ;;  %v298_v21 = vpop.f32.mrb[1].mxu1 }
 0x14c   :  { %v1983_v22 = vpop.f32.mrb[0].mxu0  ;;  %v2539_v23 = vadd.f32 %v1884_v17, %v298_v21 }
 0x14d   :  { %v206_v24 = vpop.f32.mrb[1].mxu0  ;;  %802 = vrot.lane.b32.xlu1 %v2537_v20, %s2351_s29  ;;  %v2554_v26 = vadd.f32 %v1983_v22, %v1881_v19 }
 0x14e   :  { %v2543_v25 = vadd.f32 %v1881_v19, %v206_v24  ;;  %2007 = vmatpush3.xpose.msk.msra.mxu1 %vm393_vm2, %v2539_v23 }
 0x14f   :  { %2011 = vmatprep.subr.mxu1 %v2349_v16 }
 0x151   :  { %2009 = vmatmul.mubr.msk.f32.vlgmr.msra.gmra.mrb[2].mxu1 %vm393_vm2, %v2543_v25 }
 0x152   :  { %2012 = vmatpush3.xpose.msk.msra.mxu1 %vm393_vm2, %v2537_v20  ;;  %2013 = vmatprep.mubr.msk.f32.mxu1 %vm2350_vm1, %v2349_v16 }
 0x153   :  { %2016 = vmatprep.subr.mxu1 %v2349_v16 }
 0x154   :  { %v2005_v50 = vpop.f32.mrb[2].mxu0 }
 0x155   :  { %2014 = vmatmul.mubr.msk.f32.vlgmr.msra.gmra.mrb[4].mxu1 %vm393_vm2, %v2554_v26  ;;  %v384_v52 = vpop.f32.mrb[3].mxu0  ;;  %v2580_v53 = vadd.f32 %v2005_v50, %v1887_v51 }
 0x156   :  { %2018 = vmatprep.mubr.msk.f32.mxu1 %vm2350_vm1, %v2349_v16  ;;  %v2582_v54 = vadd.f32 %v1887_v51, %v384_v52 }
 0x158   :  { %2017 = vmatpush3.msra.mxu1 %v2582_v54 }
 0x159   :  { %2021 = vmatprep.subr.mxu1 %v2349_v16 }
 0x1bf   :  { %v803_v55 = vpop.permute.xlu1 %802 }
 0x224   :  { %v466_v33 = vpop.f32.mrb[2].mxu1 }
 0x225   :  { %v2010_v34 = vpop.f32.mrb[3].mxu1  ;;  %v546_v35 = vsel %vm393_vm2, %v466_v33, -inf }
 0x226   :  { %547 = vmax.xlane.f32.xlu0 %v546_v35 }
 0x228   :  { %v542_v36 = vpop.f32.mrb[4].mxu1 }
 0x229   :  { %v2015_v37 = vpop.f32.mrb[5].mxu1  ;;  %v549_v38 = vsel %vm393_vm2, %v542_v36, -inf }
 0x22a   :  { %550 = vmax.xlane.f32.xlu0 %v549_v38 }
 0x240   :  { %724 = vrot.lane.b32.xlu0 %v2539_v23, %s2351_s29 }
 0x2b3   :  { %v548_v39 = vpop.xlane.xlu0 %547 }
 0x2b4   :  { %v552_v40 = vsub.f32 %v466_v33, %v548_v39 }
 0x2b6   :  { %v554_v41 = vmul.f32 1.442695, %v552_v40 }
 0x2b7   :  { %v551_v42 = vpop.xlane.xlu0 %550 }
 0x2b8   :  { %2145 = vpow2.f32 %v554_v41  ;;  %v553_v43 = vsub.f32 %v542_v36, %v551_v42 }
 0x2ba   :  { %v556_v44 = vmul.f32 1.442695, %v553_v43 }
 0x2bb   :  { %v725_v45 = vpop.permute.xlu0 %724 }
 0x2bc   :  { %2147 = vpow2.f32 %v556_v44  ;;  %2027 = vmatpush3.xpose.msk.msra.mxu0 %vm393_vm2, %v725_v45 }
 0x2bd   :  { %2036 = vmatprep.subr.mxu0 %v2349_v16 }
 0x2c2   :  { %v2146_v46 = vpop.eup %2145 }
 0x2c3   :  { %v558_v47 = vsel %vm393_vm2, %v2146_v46, 0.0 }
 0x2c4   :  { %559 = vadd.xlane.f32.xlu1 %v558_v47 }
 0x2c6   :  { %v2148_v48 = vpop.eup %2147 }
 0x2c7   :  { %v561_v49 = vsel %vm393_vm2, %v2148_v48, 0.0 }
 0x2c8   :  { %562 = vadd.xlane.f32.xlu1 %v561_v49 }
 0x2d9   :  { %722 = vrot.lane.b32.xlu1 %v2543_v25, %s2351_s29 }
 0x2dd   :  { %800 = vrot.lane.b32.xlu1 %v2554_v26, %s2351_s29 }
 0x351   :  { %v560_v56 = vpop.xlane.xlu1 %559 }
 0x352   :  { %2149 = vrcp.f32 %v560_v56 }
 0x355   :  { %v563_v57 = vpop.xlane.xlu1 %562 }
 0x356   :  { %2151 = vrcp.f32 %v563_v57 }
 0x359   :  { %v723_v58 = vpop.permute.xlu1 %722 }
 0x35a   :  { %2029 = vmatmul.mubr.msk.f32.vlgmr.msra.gmra.mrb[4].mxu0 %vm393_vm2, %v723_v58 }
 0x35b   :  { %2038 = vmatprep.mubr.msk.f32.mxu0 %vm2350_vm1, %v2349_v16 }
 0x35c   :  { %v2150_v59 = vpop.eup %2149 }
 0x35d   :  { %v566_v60 = vmul.f32 %v2150_v59, %v560_v56  ;;  %v801_v5 = vpop.permute.xlu1 %800 }
 0x35f   :  { %v568_v61 = vsub.f32 2.0, %v566_v60 }
 0x360   :  { %v2152_v62 = vpop.eup %2151 }
 0x361   :  { %v570_v63 = vmul.f32 %v2150_v59, %v568_v61  ;;  %v567_v0 = vmul.f32 %v2152_v62, %v563_v57 }
 0x363   :  { %v572_v1 = vmul.f32 %v2146_v46, %v570_v63  ;;  %v569_v2 = vsub.f32 2.0, %v567_v0 }
 0x365   :  { %v571_v3 = vmul.f32 %v2152_v62, %v569_v2  ;;  %2019 = vmatmul.mubr.msk.f32.vlgmr.msra.gmra.mrb[6].mxu1 %vm393_vm2, %v572_v1 }
 0x366   :  { %2022 = vmatpush3.msra.mxu1 %v2580_v53  ;;  %2023 = vmatprep.mubr.msk.f32.mxu1 %vm2350_vm1, %v2349_v16 }
 0x367   :  { %v573_v4 = vmul.f32 %v2148_v48, %v571_v3  ;;  %2031 = vmatprep.subr.mxu1 %v2349_v16 }
 0x369   :  { %2024 = vmatmul.mubr.msk.f32.vlgmr.msra.gmra.mrb[8].mxu1 %vm393_vm2, %v573_v4 }
 0x36a   :  { %2033 = vmatprep.mubr.msk.f32.mxu1 %vm2350_vm1, %v2349_v16 }
 0x36d   :  { %2032 = vmatpush3.xpose.msk.msra.mxu1 %vm393_vm2, %v803_v55 }
 0x36e   :  { %2041 = vmatprep.subr.mxu1 %v2349_v16 }
 0x370   :  { %2034 = vmatmul.mubr.msk.f32.vlgmr.msra.gmra.mrb[10].mxu1 %vm393_vm2, %v801_v5 }
 0x371   :  { %2043 = vmatprep.mubr.msk.f32.mxu1 %vm2350_vm1, %v2349_v16 }
 0x42d   :  { %v796_v6 = vpop.f32.mrb[4].mxu0 }
 0x42e   :  { %v2030_v7 = vpop.f32.mrb[5].mxu0  ;;  %v878_v8 = vsel %vm393_vm2, %v796_v6, -inf }
 0x42f   :  { %879 = vmax.xlane.f32.xlu0 %v878_v8 }
 0x438   :  { %v643_v9 = vpop.f32.mrb[6].mxu1 }
 0x439   :  { %720 = vst.msk [vmem:[#allocation2] sm:$0xff] %vm393_vm2, %v643_v9  ;;  %v2020_v10 = vpop.f32.mrb[7].mxu1 }
 0x43c   :  { %v716_v11 = vpop.f32.mrb[8].mxu1 }
 0x43d   :  { %721 = vst.msk [vmem:[#allocation2 + $0x8] sm:$0xff] %vm393_vm2, %v716_v11  ;;  %v2025_v12 = vpop.f32.mrb[9].mxu1 }
 0x443   :  { %v874_v13 = vpop.f32.mrb[10].mxu1 }
 0x444   :  { %v2035_v14 = vpop.f32.mrb[11].mxu1  ;;  %v881_v15 = vsel %vm393_vm2, %v874_v13, -inf }
 0x445   :  { %882 = vmax.xlane.f32.xlu1 %v881_v15 }
 0x456   :  { %984 = vrot.lane.b32.xlu1 %v2580_v53, %s2351_s29 }
 0x45a   :  { %1073 = vrot.lane.b32.xlu1 %v2539_v23, %s2352_s7 }
 0x45e   :  { %1151 = vrot.lane.b32.xlu1 %v2537_v20, %s2352_s7 }
 0x462   :  { %1149 = vrot.lane.b32.xlu1 %v2554_v26, %s2352_s7 }
 0x4bc   :  { %v880_v17 = vpop.xlane.xlu0 %879 }
 0x4bd   :  { %v884_v18 = vsub.f32 %v796_v6, %v880_v17 }
 0x4bf   :  { %v886_v19 = vmul.f32 1.442695, %v884_v18 }
 0x4c1   :  { %2153 = vpow2.f32 %v886_v19 }
 0x4cb   :  { %v2154_v21 = vpop.eup %2153 }
 0x4cc   :  { %v890_v22 = vsel %vm393_vm2, %v2154_v21, 0.0 }
 0x4cd   :  { %891 = vadd.xlane.f32.xlu0 %v890_v22 }
 0x4d2   :  { %v883_v24 = vpop.xlane.xlu1 %882 }
 0x4d3   :  { %v885_v27 = vsub.f32 %v874_v13, %v883_v24 }
 0x4d5   :  { %v888_v28 = vmul.f32 1.442695, %v885_v27 }
 0x4d6   :  { %v985_v29 = vpop.permute.xlu1 %984 }
 0x4d7   :  { %2155 = vpow2.f32 %v888_v28  ;;  %2042 = vmatpush3.msra.mxu1 %v985_v29 }
 0x4d8   :  { %2051 = vmatprep.subr.mxu1 %v2349_v16 }
 0x4da   :  { %v1074_v41 = vpop.permute.xlu1 %1073 }
 0x4de   :  { %v1152_v46 = vpop.permute.xlu1 %1151 }
 0x4e1   :  { %v2156_v30 = vpop.eup %2155 }
 0x4e2   :  { %v893_v31 = vsel %vm393_vm2, %v2156_v30, 0.0  ;;  %v1150_v48 = vpop.permute.xlu1 %1149 }
 0x4e3   :  { %894 = vadd.xlane.f32.xlu0 %v893_v31 }
 0x4f9   :  { %907 = vrot.lane.b32.xlu0 %v2582_v54, %s2351_s29 }
 0x4fd   :  { %1071 = vrot.lane.b32.xlu0 %v2543_v25, %s2352_s7 }
 0x55a   :  { %v892_v32 = vpop.xlane.xlu0 %891 }
 0x55b   :  { %2157 = vrcp.f32 %v892_v32 }
 0x565   :  { %v2158_v33 = vpop.eup %2157 }
 0x566   :  { %v898_v34 = vmul.f32 %v2158_v33, %v892_v32 }
 0x568   :  { %v900_v35 = vsub.f32 2.0, %v898_v34 }
 0x56a   :  { %v902_v36 = vmul.f32 %v2158_v33, %v900_v35 }
 0x56c   :  { %v904_v38 = vmul.f32 %v2154_v21, %v902_v36 }
 0x570   :  { %v895_v37 = vpop.xlane.xlu0 %894 }
 0x571   :  { %2159 = vrcp.f32 %v895_v37 }
 0x574   :  { %v908_v39 = vpop.permute.xlu0 %907 }
 0x575   :  { %2037 = vmatpush3.msra.mxu0 %v908_v39 }
 0x576   :  { %2039 = vmatmul.mubr.msk.f32.vlgmr.msra.gmra.mrb[6].mxu0 %vm393_vm2, %v904_v38  ;;  %2046 = vmatprep.subr.mxu0 %v2349_v16 }
 0x577   :  { %2048 = vmatprep.mubr.msk.f32.mxu0 %vm2350_vm1, %v2349_v16 }
 0x578   :  { %v1072_v44 = vpop.permute.xlu0 %1071 }
 0x57b   :  { %v2160_v40 = vpop.eup %2159 }
 0x57c   :  { %v899_v42 = vmul.f32 %v2160_v40, %v895_v37  ;;  %2047 = vmatpush3.xpose.msk.msra.mxu0 %vm393_vm2, %v1074_v41 }
 0x57d   :  { %2056 = vmatprep.subr.mxu0 %v2349_v16 }
 0x57e   :  { %v901_v43 = vsub.f32 2.0, %v899_v42 }
 0x57f   :  { %2049 = vmatmul.mubr.msk.f32.vlgmr.msra.gmra.mrb[8].mxu0 %vm393_vm2, %v1072_v44 }
 0x580   :  { %v903_v45 = vmul.f32 %v2160_v40, %v901_v43  ;;  %2058 = vmatprep.mubr.msk.f32.mxu0 %vm2350_vm1, %v2349_v16 }
 0x582   :  { %v905_v47 = vmul.f32 %v2156_v30, %v903_v45 }
 0x584   :  { %2044 = vmatmul.mubr.msk.f32.vlgmr.msra.gmra.mrb[12].mxu1 %vm393_vm2, %v905_v47 }
 0x585   :  { %2052 = vmatpush3.xpose.msk.msra.mxu1 %vm393_vm2, %v1152_v46  ;;  %2053 = vmatprep.mubr.msk.f32.mxu1 %vm2350_vm1, %v2349_v16 }
 0x586   :  { %2061 = vmatprep.subr.mxu1 %v2349_v16 }
 0x588   :  { %2054 = vmatmul.mubr.msk.f32.vlgmr.msra.gmra.mrb[14].mxu1 %vm393_vm2, %v1150_v48 }
 0x589   :  { %2063 = vmatprep.mubr.msk.f32.mxu1 %vm2350_vm1, %v2349_v16 }
 0x649   :  { %v2638_v49 = vpop.f32.mrb[6].mxu0 }
 0x64a   :  { %v2040_v50 = vpop.f32.mrb[7].mxu0 }
 0x652   :  { %v1145_v51 = vpop.f32.mrb[8].mxu0 }
 0x653   :  { %v2050_v52 = vpop.f32.mrb[9].mxu0  ;;  %v1227_v55 = vsel %vm393_vm2, %v1145_v51, -inf }
 0x654   :  { %1228 = vmax.xlane.f32.xlu0 %v1227_v55 }
 0x657   :  { %v2641_v56 = vpop.f32.mrb[12].mxu1 }
 0x658   :  { %v2045_v57 = vpop.f32.mrb[13].mxu1 }
 0x65b   :  { %v1223_v58 = vpop.f32.mrb[14].mxu1 }
 0x65c   :  { %v2055_v59 = vpop.f32.mrb[15].mxu1  ;;  %v1230_v60 = vsel %vm393_vm2, %v1223_v58, -inf }
 0x65d   :  { %1231 = vmax.xlane.f32.xlu1 %v1230_v60 }
 0x66e   :  { %1331 = vrot.lane.b32.xlu1 %v2580_v53, %s2352_s7 }
 0x672   :  { %1420 = vrot.lane.b32.xlu1 %v2539_v23, %s2353_s30 }
 0x676   :  { %1498 = vrot.lane.b32.xlu1 %v2537_v20, %s2353_s30 }
 0x67a   :  { %1496 = vrot.lane.b32.xlu1 %v2554_v26, %s2353_s30 }
 0x6e1   :  { %v1229_v61 = vpop.xlane.xlu0 %1228 }
 0x6e2   :  { %v1233_v62 = vsub.f32 %v1145_v51, %v1229_v61 }
 0x6e4   :  { %v1235_v63 = vmul.f32 1.442695, %v1233_v62 }
 0x6e6   :  { %2161 = vpow2.f32 %v1235_v63  ;;  %v1767_v63 = vld [vmem:[#allocation12] sm:$0xff] }
 0x6ea   :  { %v1232_v0 = vpop.xlane.xlu1 %1231 }
 0x6eb   :  { %v1234_v1 = vsub.f32 %v1223_v58, %v1232_v0  ;;  %v1768_v0 = vld [vmem:[#allocation12 + $0x8] sm:$0xff] }
 0x6ed   :  { %v1237_v2 = vmul.f32 1.442695, %v1234_v1  ;;  %v2121_v1 = vpack.c.bf16 %v1768_v0, %v1767_v63 }
 0x6ee   :  { %v1332_v3 = vpop.permute.xlu1 %1331 }
 0x6ef   :  { %2163 = vpow2.f32 %v1237_v2  ;;  %2062 = vmatpush3.msra.mxu1 %v1332_v3  ;;  %v1769_v2 = vld [vmem:[#allocation12 + $0x10] sm:$0xff]  ;;  %v1770_v3 = vld [vmem:[#allocation12 + $0x18] sm:$0xff] }
 0x6f0   :  { %v2162_v4 = vpop.eup %2161  ;;  %2071 = vmatprep.subr.mxu1 %v2349_v16 }
 0x6f1   :  { %v1239_v23 = vsel %vm393_vm2, %v2162_v4, 0.0 }
 0x6f2   :  { %1240 = vadd.xlane.f32.xlu0 %v1239_v23  ;;  %v1421_v14 = vpop.permute.xlu1 %1420 }
 0x6f6   :  { %v1499_v19 = vpop.permute.xlu1 %1498 }
 0x6f9   :  { %v2164_v20 = vpop.eup %2163 }
 0x6fa   :  { %v1242_v5 = vsel %vm393_vm2, %v2164_v20, 0.0  ;;  %v1497_v22 = vpop.permute.xlu1 %1496 }
 0x6fb   :  { %1243 = vadd.xlane.f32.xlu0 %v1242_v5 }
 0x711   :  { %1255 = vrot.lane.b32.xlu0 %v2582_v54, %s2352_s7 }
 0x715   :  { %1418 = vrot.lane.b32.xlu0 %v2543_v25, %s2353_s30 }
 0x77f   :  { %v1241_v26 = vpop.xlane.xlu0 %1240 }
 0x780   :  { %2165 = vrcp.f32 %v1241_v26 }
 0x788   :  { %v1244_v6 = vpop.xlane.xlu0 %1243 }
 0x789   :  { %2167 = vrcp.f32 %v1244_v6 }
 0x78a   :  { %v2166_v7 = vpop.eup %2165 }
 0x78b   :  { %v1247_v8 = vmul.f32 %v2166_v7, %v1241_v26 }
 0x78c   :  { %v1256_v9 = vpop.permute.xlu0 %1255 }
 0x78d   :  { %v1249_v10 = vsub.f32 2.0, %v1247_v8  ;;  %2057 = vmatpush3.msra.mxu0 %v1256_v9 }
 0x78e   :  { %2066 = vmatprep.subr.mxu0 %v2349_v16 }
 0x78f   :  { %v1251_v11 = vmul.f32 %v2166_v7, %v1249_v10  ;;  %v1914_v10 = vld [vmem:[%s2723_s9] ss:$0 sm:$0xff] }
 0x790   :  { %v1419_v17 = vpop.permute.xlu0 %1418 }
 0x791   :  { %v1253_v12 = vmul.f32 %v2162_v4, %v1251_v11  ;;  %v2125_v4 = vpack.c.bf16 %v1770_v3, %v1769_v2 }
 0x793   :  { %v2168_v13 = vpop.eup %2167  ;;  %2059 = vmatmul.mubr.msk.f32.vlgmr.msra.gmra.mrb[10].mxu0 %vm393_vm2, %v1253_v12 }
 0x794   :  { %v1248_v15 = vmul.f32 %v2168_v13, %v1244_v6  ;;  %2067 = vmatpush3.xpose.msk.msra.mxu0 %vm393_vm2, %v1421_v14  ;;  %2068 = vmatprep.mubr.msk.f32.mxu0 %vm2350_vm1, %v2349_v16 }
 0x795   :  { %2076 = vmatprep.subr.mxu0 %v2349_v16 }
 0x796   :  { %v1250_v25 = vsub.f32 2.0, %v1248_v15 }
 0x797   :  { %2069 = vmatmul.mubr.msk.f32.vlgmr.msra.gmra.mrb[12].mxu0 %vm393_vm2, %v1419_v17 }
 0x798   :  { %v1252_v18 = vmul.f32 %v2168_v13, %v1250_v25  ;;  %2078 = vmatprep.mubr.msk.f32.mxu0 %vm2350_vm1, %v2349_v16 }
 0x79a   :  { %v1254_v21 = vmul.f32 %v2164_v20, %v1252_v18 }
 0x79c   :  { %2064 = vmatmul.mubr.msk.f32.vlgmr.msra.gmra.mrb[16].mxu1 %vm393_vm2, %v1254_v21 }
 0x79d   :  { %2072 = vmatpush3.xpose.msk.msra.mxu1 %vm393_vm2, %v1499_v19  ;;  %2073 = vmatprep.mubr.msk.f32.mxu1 %vm2350_vm1, %v2349_v16 }
 0x79e   :  { %2081 = vmatprep.subr.mxu1 %v2349_v16 }
 0x7a0   :  { %2074 = vmatmul.mubr.msk.f32.vlgmr.msra.gmra.mrb[18].mxu1 %vm393_vm2, %v1497_v22 }
 0x7a1   :  { %2083 = vmatprep.mubr.msk.f32.mxu1 %vm2350_vm1, %v2349_v16 }
 0x866   :  { %v1327_v24 = vpop.f32.mrb[10].mxu0 }
 0x867   :  { %v2060_v27 = vpop.f32.mrb[11].mxu0 }
 0x86a   :  { %v1492_v28 = vpop.f32.mrb[12].mxu0 }
 0x86b   :  { %v2070_v29 = vpop.f32.mrb[13].mxu0  ;;  %v1574_v30 = vsel %vm393_vm2, %v1492_v28, -inf }
 0x86c   :  { %1575 = vmax.xlane.f32.xlu0 %v1574_v30 }
 0x86f   :  { %v1403_v31 = vpop.f32.mrb[16].mxu1 }
 0x870   :  { %v2065_v32 = vpop.f32.mrb[17].mxu1 }
 0x873   :  { %v1570_v33 = vpop.f32.mrb[18].mxu1 }
 0x874   :  { %v2075_v34 = vpop.f32.mrb[19].mxu1  ;;  %v1577_v35 = vsel %vm393_vm2, %v1570_v33, -inf }
 0x875   :  { %1578 = vmax.xlane.f32.xlu1 %v1577_v35 }
 0x886   :  { %1678 = vrot.lane.b32.xlu1 %v2580_v53, %s2353_s30 }
 0x88a   :  { %1062 = vrot.lane.b32.xlu1 %v2638_v49, %s2344_s26 }
 0x88e   :  { %1064 = vrot.lane.b32.xlu1 %v2641_v56, %s2344_s26 }
 0x892   :  { %1411 = vrot.lane.b32.xlu1 %v1403_v31, %s2354_s11 }
 0x8f9   :  { %v1576_v16 = vpop.xlane.xlu0 %1575 }
 0x8fa   :  { %v1580_v36 = vsub.f32 %v1492_v28, %v1576_v16 }
 0x8fc   :  { %v1582_v37 = vmul.f32 1.442695, %v1580_v36 }
 0x8fe   :  { %2169 = vpow2.f32 %v1582_v37 }
 0x902   :  { %v1579_v38 = vpop.xlane.xlu1 %1578 }
 0x903   :  { %v1581_v39 = vsub.f32 %v1570_v33, %v1579_v38 }
 0x905   :  { %v1584_v40 = vmul.f32 1.442695, %v1581_v39 }
 0x906   :  { %v1679_v41 = vpop.permute.xlu1 %1678 }
 0x907   :  { %2171 = vpow2.f32 %v1584_v40  ;;  %2082 = vmatpush3.msra.mxu1 %v1679_v41 }
 0x908   :  { %v2170_v42 = vpop.eup %2169 }
 0x909   :  { %v1586_v53 = vsel %vm393_vm2, %v2170_v42, 0.0 }
 0x90a   :  { %1587 = vadd.xlane.f32.xlu0 %v1586_v53  ;;  %v1063_v43 = vpop.permute.xlu1 %1062 }
 0x90b   :  { %1069 = vst.msk [vmem:[#allocation2] sm:$0xff] %vm1068_vm3, %v1063_v43 }
 0x90e   :  { %v1065_v44 = vpop.permute.xlu1 %1064 }
 0x90f   :  { %1070 = vst.msk [vmem:[#allocation2 + $0x8] sm:$0xff] %vm1068_vm3, %v1065_v44 }
 0x911   :  { %v2172_v45 = vpop.eup %2171 }
 0x912   :  { %v1412_v46 = vpop.permute.xlu1 %1411  ;;  %v1589_v47 = vsel %vm393_vm2, %v2172_v45, 0.0 }
 0x913   :  { %1417 = vst.msk [vmem:[#allocation2 + $0x8] sm:$0xff] %vm1415_vm4, %v1412_v46  ;;  %1590 = vadd.xlane.f32.xlu0 %v1589_v47 }
 0x929   :  { %1602 = vrot.lane.b32.xlu0 %v2582_v54, %s2353_s30 }
 0x92d   :  { %1409 = vrot.lane.b32.xlu0 %v1327_v24, %s2354_s11 }
 0x997   :  { %v1588_v48 = vpop.xlane.xlu0 %1587 }
 0x998   :  { %2173 = vrcp.f32 %v1588_v48 }
 0x9a0   :  { %v1591_v49 = vpop.xlane.xlu0 %1590 }
 0x9a1   :  { %2175 = vrcp.f32 %v1591_v49 }
 0x9a2   :  { %v2174_v50 = vpop.eup %2173 }
 0x9a3   :  { %v1594_v51 = vmul.f32 %v2174_v50, %v1588_v48 }
 0x9a4   :  { %v1603_v52 = vpop.permute.xlu0 %1602 }
 0x9a5   :  { %v1596_v55 = vsub.f32 2.0, %v1594_v51  ;;  %2077 = vmatpush3.msra.mxu0 %v1603_v52 }
 0x9a6   :  { %2122 = vmatprep.subr.bf16.mxu0 %v2121_v1 }
 0x9a7   :  { %v1598_v56 = vmul.f32 %v2174_v50, %v1596_v55 }
 0x9a8   :  { %v1410_v57 = vpop.permute.xlu0 %1409 }
 0x9a9   :  { %v1600_v58 = vmul.f32 %v2170_v42, %v1598_v56  ;;  %1416 = vst.msk [vmem:[#allocation2] sm:$0xff] %vm1415_vm4, %v1410_v57 }
 0x9ab   :  { %v2176_v59 = vpop.eup %2175  ;;  %2079 = vmatmul.mubr.msk.f32.vlgmr.msra.gmra.mrb[14].mxu0 %vm393_vm2, %v1600_v58 }
 0x9ac   :  { %v1595_v60 = vmul.f32 %v2176_v59, %v1591_v49  ;;  %2124 = vmatpush3.bf16.msra.mxu0 %v2121_v1 }
 0x9ad   :  { %2126 = vmatprep.subr.bf16.mxu0 %v2125_v4 }
 0x9ae   :  { %v1597_v54 = vsub.f32 2.0, %v1595_v60 }
 0x9b0   :  { %v1599_v61 = vmul.f32 %v2176_v59, %v1597_v54  ;;  %2128 = vmatpush3.bf16.msra.mxu0 %v2125_v4 }
 0x9b2   :  { %v1601_v62 = vmul.f32 %v2172_v45, %v1599_v61 }
 0x9b4   :  { %2084 = vmatmul.mubr.msk.f32.vlgmr.msra.gmra.mrb[20].mxu1 %vm393_vm2, %v1601_v62 }
 0xa7e   :  { %v1674_v23 = vpop.f32.mrb[14].mxu0 }
 0xa7f   :  { %1756 = vrot.lane.b32.xlu0 %v1674_v23, %s2355_s4  ;;  %v2080_v20 = vpop.f32.mrb[15].mxu0 }
 0xa87   :  { %v1750_v5 = vpop.f32.mrb[20].mxu1 }
 0xa88   :  { %1758 = vrot.lane.b32.xlu1 %v1750_v5, %s2355_s4  ;;  %v2085_v26 = vpop.f32.mrb[21].mxu1 }
 0xaf1   :  { %v1757_v6 = vpop.permute.xlu0 %1756 }
 0xaf2   :  { %1763 = vst.msk [vmem:[#allocation2] sm:$0xff] %vm1762_vm5, %v1757_v6 }
 0xaf9   :  { %v1765_v7 = vld [vmem:[#allocation2] sm:$0xff] }
 0xafa   :  { %2094 = vmatprep.mubr.msk.f32.mxu0 %vm133_vm0, %v1765_v7  ;;  %v1759_v8 = vpop.permute.xlu1 %1758 }
 0xafb   :  { %1764 = vst.msk [vmem:[#allocation2 + $0x8] sm:$0xff] %vm1762_vm5, %v1759_v8 }
 0xb02   :  { %v1766_v9 = vld [vmem:[#allocation2 + $0x8] sm:$0xff] }
 0xb03   :  { %2095 = vmatmul.mubr.msk.f32.vlgmr.msra.gmra.mrb[16].mxu0 %vm133_vm0, %v1766_v9 }
 0xbd6   :  { %v2096_v11 = vpop.f32.mrb[16].mxu0 }
 0xbd7   :  { %v1856_v12 = vadd.f32 %v2096_v11, %v1914_v10  ;;  %v1850_v13 = vpop.f32.mrb[17].mxu0 }
 0xbd8   :  { %v1851_v14 = vadd.f32 %v1914_v10, %v1850_v13 }
 0xbd9   :  { %1860 = vst.msk [vmem:[#allocation14 + $0x8] sm:$0xff] %vm133_vm0, %v1856_v12 }
 0xbda   :  { %1859 = vst.msk [vmem:[#allocation14] sm:$0xff] %vm133_vm0, %v1851_v14 }
 0xbdb   :  { %2320 = shalt.err (!%p2317_p10)
}
 0xbdc   :  { %s2321_s17 = scalar_lea.hbm %s2724_s10, 256 }
 0xbdd   :  { %p2322_p11 = scmp.ne.s32.totalorder %s2724_s10, %s2321_s17  ;;  %p2325_p12 = scmp.lt.u32.totalorder %s2321_s17, %s2724_s10 }
 0xbdf   :  { %p2327_p13 = pnand %p2325_p12, %p2322_p11 }
 0xbe1   :  { %2330 = shalt.err (!%p2327_p13)
}
 0xbe2   :  { %1872 = dma.vmem_to_hbm [thread:$0]  %s1867_s2, 256, %s2724_s10, [#allocation5], %s2343_s25, %s2343_s25, %s2344_s26  }
 0xbe3   :  { %2339 = dma.done.wait [#allocation5], 256  }
 0xbe4   :  { %2340 = vsyncadd [#allocation5], 4294967040 }
 0xbe5   :  { %1876 = vsyncpa [#allocation4], 1 }
 0xbe6   :  { %1877 = vsyncpa [#allocation7], 1 }
 0xbe7   :  { %1878 = vsyncpa [#allocation10], 1 }
 0xbe8   :  { %1879 = vsyncpa [#allocation13], 1 }
 0xbe9   :  { %1880 = vsyncpa [#allocation5], 1 }

</bundles_post_ra>
